<compile_context>
chip_gen: v6e
topology: v6e:2x2x1
jax: 0.10.0
libtpu: 0.0.40
codegen_flags: <defaults>
</compile_context>

<pallas_src>
import functools

import jax
import jax.numpy as jnp
from jax import lax
from jax.experimental import pallas as pl
from jax.experimental.pallas import tpu as pltpu

_LEAKY_SLOPE = 0.2
_NORM_EPS = 1e-12  # F.normalize default eps


def _attn_combine_kernel(x_ref, o_ref, *, activation):
    """activation in {'none', 'relu', 'leaky_relu'} (static)."""
    x = x_ref[...].astype(jnp.float32)

    if activation == "relu":
        y = jnp.maximum(x, 0.0)
    elif activation == "leaky_relu":
        y = jnp.where(x >= 0.0, x, _LEAKY_SLOPE * x)
    else:
        y = x

    # F.normalize(dim=1): x / max(||x||_2, eps)  ==  x * rsqrt(max(||x||^2, eps^2))
    sq_sum = jnp.sum(y * y, axis=-1, keepdims=True)          # [tile_n, 1]
    inv = lax.rsqrt(jnp.maximum(sq_sum, _NORM_EPS * _NORM_EPS))
    o_ref[...] = (y * inv).astype(o_ref.dtype)


def _choose_tile_n(N, D):
    """Largest row tile (~256K elems, ~1 MiB f32 / buffer) that makes sense for N."""
    target_elems = 256 * 1024
    tile_n = max(8, target_elems // max(D, 1))
    tile_n = (tile_n // 8) * 8                 # sublane-aligned
    if tile_n >= N:
        return N                               # single full-extent block
    return max(tile_n, 8)


def attn_combine(agg_out, *, relu=False, leaky_relu=False, tile_n=None):
    """Pallas implementation of AttnCombine.forward applied to aggregator output.

    agg_out: [N, D] float array (output of the external aggregator).
    """
    if relu:
        activation = "relu"
    elif leaky_relu:
        activation = "leaky_relu"
    else:
        activation = "none"

    N, D = agg_out.shape
    if tile_n is None:
        tile_n = _choose_tile_n(N, D)
    if tile_n >= N:
        tile_n = N                              # full extent -> no (8,) divisibility needed
    else:
        tile_n = max(8, (tile_n // 8) * 8)      # second-to-last dim must be 8-aligned
    grid_n = pl.cdiv(N, tile_n)                 # partial last block is padded/masked by Pallas

    # VMEM budget: double-buffered in + out tiles at I/O dtype + f32 compute slab.
    dtype_bytes = jnp.dtype(agg_out.dtype).itemsize
    vmem_needed = 2 * 2 * tile_n * D * dtype_bytes + 2 * tile_n * D * 4
    vmem_limit = int(min(max(vmem_needed + (4 << 20), 16 << 20), 48 << 20))

    kernel = functools.partial(_attn_combine_kernel, activation=activation)

    return pl.pallas_call(
        kernel,
        out_shape=jax.ShapeDtypeStruct((N, D), agg_out.dtype),
        grid_spec=pl.GridSpec(
            grid=(grid_n,),
            in_specs=[pl.BlockSpec((tile_n, D), lambda i: (i, 0))],
            out_specs=pl.BlockSpec((tile_n, D), lambda i: (i, 0)),
        ),
        compiler_params=pltpu.CompilerParams(
            dimension_semantics=("parallel",),
            vmem_limit_bytes=vmem_limit,
        ),
    )(agg_out)


def _reference(agg_out, *, relu=False, leaky_relu=False):
    x = agg_out.astype(jnp.float32)
    if relu:
        x = jnp.maximum(x, 0.0)
    elif leaky_relu:
        x = jnp.where(x >= 0.0, x, _LEAKY_SLOPE * x)
    norm = jnp.sqrt(jnp.sum(x * x, axis=-1, keepdims=True))
    return (x / jnp.maximum(norm, _NORM_EPS)).astype(agg_out.dtype)


if __name__ == "__main__":
    key = jax.random.PRNGKey(0)

    num_graph_nodes = 64   # total nodes in the feature store
    hidden = 128           # aggregator output hidden dim
    batch_n = 16           # number of query nodes in the batch
    num_neighbors = 4      # neighbors per node in adj_lists

    k_feat, _ = jax.random.split(key)
    feature_table = jax.random.normal(k_feat, (num_graph_nodes, hidden), jnp.float32)

    # Deterministic "adj_lists": fixed neighbor ids per query node.
    nodes = jnp.arange(batch_n, dtype=jnp.int32)
    adj = (nodes[:, None] * 3 + jnp.arange(num_neighbors)[None, :]) % num_graph_nodes

    # TODO(synk): the aggregator is an external module in zsl_kg_lite; stand in
    # with a deterministic mean-over-neighbors aggregation (plain-JAX glue).
    agg_out = jnp.mean(feature_table[adj], axis=1)  # [batch_n, hidden]

    # LeakyReLU(0.2) path (as in the original flags relu=False, leaky_relu=True).
    out = attn_combine(agg_out, relu=False, leaky_relu=True)
    out = jax.block_until_ready(out)
    ref = _reference(agg_out, relu=False, leaky_relu=True)
    assert out.shape == (batch_n, hidden)
    assert jnp.allclose(out, ref, atol=1e-5, rtol=1e-5)

    # Exercise multi-tile + padded last block path (grid > 1, N not multiple of tile).
    nodes2 = jnp.arange(40, dtype=jnp.int32)
    adj2 = (nodes2[:, None] * 5 + jnp.arange(num_neighbors)[None, :]) % num_graph_nodes
    agg_out2 = jnp.mean(feature_table[adj2], axis=1)          # [40, hidden]
    out2 = attn_combine(agg_out2, relu=True, tile_n=16)        # grid=(3,), last block padded
    out2 = jax.block_until_ready(out2)
    ref2 = _reference(agg_out2, relu=True)
    assert out2.shape == (40, hidden)
    assert jnp.allclose(out2, ref2, atol=1e-5, rtol=1e-5)

    print("KERNEL_OK")
</pallas_src>

<mosaic_0001>
module attributes {stable_mosaic.version = 11 : i64} {
  func.func @_attn_combine_kernel(%arg0: i32, %arg1: memref<16x128xf32, #tpu.memory_space<vmem>>, %arg2: memref<16x128xf32, #tpu.memory_space<vmem>>) attributes {dimension_semantics = [#tpu.dimension_semantics<parallel>], iteration_bounds = array<i64: 1>, scalar_prefetch = 0 : i64, scratch_operands = 0 : i64, tpu.core_type = #tpu.core_type<tc>, window_params = [{transform_indices = @transform_0, window_bounds = array<i64: 16, 128>}, {transform_indices = @transform_1, window_bounds = array<i64: 16, 128>}]} {
    %c0 = arith.constant 0 : index
    %c0_0 = arith.constant 0 : index
    %0 = vector.load %arg1[%c0, %c0_0] : memref<16x128xf32, #tpu.memory_space<vmem>>, vector<16x128xf32>
    %cst = arith.constant 0.000000e+00 : f32
    %1 = vector.broadcast %cst : f32 to vector<16x128xf32>
    %2 = arith.cmpf oge, %0, %1 : vector<16x128xf32>
    %cst_1 = arith.constant 2.000000e-01 : f32
    %3 = vector.broadcast %cst_1 : f32 to vector<16x128xf32>
    %4 = arith.mulf %3, %0 : vector<16x128xf32>
    %5 = arith.select %2, %0, %4 : vector<16x128xi1>, vector<16x128xf32>
    %6 = arith.mulf %5, %5 : vector<16x128xf32>
    %cst_2 = arith.constant dense<0.000000e+00> : vector<16xf32>
    %7 = vector.multi_reduction <add>, %6, %cst_2 [1] : vector<16x128xf32> to vector<16xf32>
    %8 = vector.shape_cast %7 : vector<16xf32> to vector<16x1xf32>
    %cst_3 = arith.constant 1.000000e-24 : f32
    %9 = vector.broadcast %cst_3 : f32 to vector<16x1xf32>
    %10 = arith.maximumf %8, %9 : vector<16x1xf32>
    %11 = math.rsqrt %10 : vector<16x1xf32>
    %12 = vector.broadcast %11 : vector<16x1xf32> to vector<16x128xf32>
    %13 = arith.mulf %5, %12 : vector<16x128xf32>
    %c0_4 = arith.constant 0 : index
    %c0_5 = arith.constant 0 : index
    %14 = vector.load %arg2[%c0_4, %c0_5] : memref<16x128xf32, #tpu.memory_space<vmem>>, vector<16x128xf32>
    tpu.vector_store %arg2[%c0_4, %c0_5], %13 {strides = array<i32>} : memref<16x128xf32, #tpu.memory_space<vmem>>, vector<16x128xf32>,
    return
  }
  func.func @transform_0(%arg0: i32) -> (i32, i32) {
    %c0_i32 = arith.constant 0 : i32
    %c0_i32_0 = arith.constant 0 : i32
    return %arg0, %c0_i32 : i32, i32
  }
  func.func @transform_1(%arg0: i32) -> (i32, i32) {
    %c0_i32 = arith.constant 0 : i32
    %c0_i32_0 = arith.constant 0 : i32
    return %arg0, %c0_i32 : i32, i32
  }
}

</mosaic_0001>

<bundles_post_ra>
// kernel: tpu_custom_call.1
= control target key start
LH: loop header
LB: loop body
LE: loop exit
PB: predicated region body
PF: predicated region fallthrough
CT: control target
= control target key end

     0   :  { %6 = vsyncpa [#allocation3], 0  ;;  %s140_s0 = inlined_call_operand.hbm [shape: f32[16,128], index: 0, kind: input, shape index: {}]   ;;  %s141_s1 = inlined_call_operand.hbm [shape: f32[16,128], index: 1, kind: output, shape index: {}]  }
   0x1   :  { %7 = vsyncpa [#allocation4], 0  ;;  %s114_s6 = smov [#allocation2]  }
   0x2   :  { %s13_s7 = sshll.u32 %s114_s6, 4  ;;  %s14_s7 = int_to_ptr.vmem [resolvable:$true] %s13_s7 }
   0x3   :  { %s78_s8 = scalar_lea.vmem %s14_s7, 256  ;;  %p83_p1 = scmp.lt.s32.totalorder %s14_s7, %s14_s7 }
   0x4   :  { %p79_p0 = scmp.ne.s32.totalorder %s14_s7, %s78_s8  ;;  %p84_p2 = scmp.lt.s32.totalorder %s78_s8, %s78_s8 }
   0x6   :  { %p85_p3 = por %p84_p2, %p83_p1 }
   0x8   :  { %p86_p4 = pnand %p85_p3, %p79_p0 }
   0xa   :  { %89 = shalt.err (!%p86_p4)
}
   0xb   :  { %s115_s9 = smov 128   ;;  %s116_s10 = smov 8  }
   0xc   :  { %19 = dma.hbm_to_vmem [thread:$0]  %s140_s0, 256, %s14_s7, [#allocation3], %s115_s9, %s115_s9, %s116_s10  }
   0xd   :  { %110 = dma.done.wait [#allocation3], 256  }
   0xe   :  { %111 = vsyncadd [#allocation3], 4294967040  ;;  %v23_v0 = vld [vmem:[#allocation2] sm:$0xff]  ;;  %v24_v1 = vld [vmem:[#allocation2 + $0x8] sm:$0xff]  ;;  %s117_s0 = smov [#allocation5]  }
   0xf   :  { %vm25_vm0 = vcmp.ge.f32.partialorder %v23_v0, 0.0  ;;  %v27_v2 = vmul.f32 0.2, %v23_v0  ;;  %vm26_vm1 = vcmp.ge.f32.partialorder %v24_v1, 0.0  ;;  %v28_v3 = vmul.f32 0.2, %v24_v1 }
  0x10   :  { %s50_s13 = sshll.u32 %s117_s0, 4  ;;  %s51_s13 = int_to_ptr.vmem [resolvable:$true] %s50_s13 }
  0x11   :  { %v29_v4 = vsel %vm25_vm0, %v23_v0, %v27_v2  ;;  %v30_v5 = vsel %vm26_vm1, %v24_v1, %v28_v3  ;;  %s90_s14 = scalar_lea.vmem %s51_s13, 256  ;;  %p95_p6 = scmp.lt.s32.totalorder %s51_s13, %s51_s13 }
  0x12   :  { %v31_v6 = vmul.f32 %v29_v4, %v29_v4  ;;  %v32_v7 = vmul.f32 %v30_v5, %v30_v5  ;;  %p91_p5 = scmp.ne.s32.totalorder %s51_s13, %s90_s14  ;;  %p96_p7 = scmp.lt.s32.totalorder %s90_s14, %s90_s14 }
  0x14   :  { %33 = vadd.xlane.f32.xlu0 %v31_v6  ;;  %p97_p8 = por %p96_p7, %p95_p6 }
  0x16   :  { %p98_p9 = pnand %p97_p8, %p91_p5 }
  0x18   :  { %35 = vadd.xlane.f32.xlu0 %v32_v7 }
  0x9d   :  { %v34_v8 = vpop.xlane.xlu0 %33 }
  0x9e   :  { %v37_v9 = vmax.f32 %v34_v8, 1e-24 }
  0xa0   :  { %66 = vrsqrt.f32 %v37_v9 }
  0xa1   :  { %v36_v10 = vpop.xlane.xlu0 %35 }
  0xa2   :  { %v38_v11 = vmax.f32 %v36_v10, 1e-24 }
  0xa4   :  { %68 = vrsqrt.f32 %v38_v11 }
  0xad   :  { %v67_v12 = vpop.eup %66 }
  0xae   :  { %v41_v13 = vmul.f32 %v67_v12, %v29_v4 }
  0xb0   :  { %43 = vst [vmem:[#allocation5] sm:$0xff] %v41_v13 }
  0xb1   :  { %v69_v14 = vpop.eup %68 }
  0xb2   :  { %v42_v15 = vmul.f32 %v69_v14, %v30_v5 }
  0xb4   :  { %44 = vst [vmem:[#allocation5 + $0x8] sm:$0xff] %v42_v15 }
  0xb5   :  { %101 = shalt.err (!%p98_p9)
}
  0xb6   :  { %56 = dma.vmem_to_hbm [thread:$0]  %s51_s13, 256, %s141_s1, [#allocation4], %s115_s9, %s115_s9, %s116_s10  }
  0xb7   :  { %112 = dma.done.wait [#allocation4], 256  }
  0xb8   :  { %113 = vsyncadd [#allocation4], 4294967040 }
  0xb9   :  { %60 = vsyncpa [#allocation3], 1 }
  0xba   :  { %61 = vsyncpa [#allocation4], 1 }

</bundles_post_ra>
